<compile_context>
chip_gen: v7x
topology: tpu7x:2x2x1
jax: 0.10.0
libtpu: 0.0.40
codegen_flags: <defaults>
</compile_context>

<pallas_src>
import functools

import jax
import jax.numpy as jnp
from jax.experimental import pallas as pl
from jax.experimental.pallas import tpu as pltpu


def _round_up(x, m):
    return ((x + m - 1) // m) * m


def _sublane_tile(dtype):
    # Packed-sublane tile: 8 rows of 32-bit, 16 rows of 16-bit, 32 rows of 8-bit.
    return max(8, 32 // jnp.dtype(dtype).itemsize)


def _resblock_kernel(x_ref, w1_ref, w2_ref, b_ref, m_ref, o_ref,
                     src_ref, cat_ref, *, W, CP, PADL, cdtype):
    """Fused ResidualBlock forward for one image (one grid step = one image).

    x_ref  : (1, C, HW)        input image, channel-major, spatial flattened
    w1_ref : (Cout, 9*CP)      conv1 weights (BN1 scale folded);
                               K index = (ky*3 + kx)*CP + cin
    w2_ref : (Cout, 9*CP)      conv2 weights (BN2 scale folded)
    b_ref  : (2, Cout, 1)      folded per-channel biases (f32)
    m_ref  : (2, HW)           row 0: 1.0 where w>0 ; row 1: 1.0 where w<W-1
    o_ref  : (1, Cout, HW)     output (lane-dense store)
    src_ref: (CP, HW+2*PADL)   current stage's input + zero halo (dy bounds)
    cat_ref: (9*CP, HW)        im2col operand: nine lane-ALIGNED (dy,dx) blocks
    """
    C = x_ref.shape[1]
    HW = x_ref.shape[2]
    Cout = o_ref.shape[1]

    # Zero only what the tap build never overwrites:
    #  * halo column slabs of src (vertical / dy zero padding),
    #  * channel-pad rows of cat (they meet zero weight columns, but must not
    #    hold stale non-finite VMEM garbage).
    # Done every grid step: under megacore sharding each TC has its own
    # scratch, so a program_id()==0 gate would be insufficient.
    src_ref[:, 0:PADL] = jnp.zeros((CP, PADL), cdtype)
    src_ref[:, PADL + HW:PADL + HW + PADL] = jnp.zeros((CP, PADL), cdtype)
    if CP > C:
        for t in range(9):
            cat_ref[t * CP + C:(t + 1) * CP, :] = jnp.zeros((CP - C, HW), cdtype)

    not_left = m_ref[0:1, :]     # (1, HW): 0.0 where w == 0
    not_right = m_ref[1:2, :]    # (1, HW): 0.0 where w == W-1

    def build_taps(src_cm):
        """Write the stage input (C, HW) and its nine (dy, dx)-shifted copies.

        All nine cat blocks live at lane-aligned columns, so the stage matmul
        reads a fully aligned (9*CP, HW) operand; the unavoidable lane shifts
        happen here on (C, HW) reads, not on the matmul operands.  Arithmetic
        stays in the incoming precision; cast to the compute dtype happens at
        the aligned stores.
        """
        src_c = src_cm.astype(cdtype)
        src_ref[0:C, PADL:PADL + HW] = src_c          # aligned (PADL % 128 == 0)
        for t in range(9):
            dy, dx = t // 3 - 1, t % 3 - 1
            if dy == 0 and dx == 0:                    # center tap: reuse value
                cat_ref[t * CP:t * CP + C, :] = src_c
                continue
            start = PADL + dy * W + dx
            tap = src_ref[0:C, start:start + HW]
            if dx == -1:       # value x[h+dy, w-1]: mask w == 0 (row wrap)
                tap = tap * not_left
            elif dx == 1:      # value x[h+dy, w+1]: mask w == W-1 (row wrap)
                tap = tap * not_right
            cat_ref[t * CP:t * CP + C, :] = tap

    def conv3x3(w_ref_l):
        # Single K = 9*CP matmul per stage, f32 accumulation on the MXU.
        return jnp.dot(w_ref_l[...], cat_ref[...],
                       preferred_element_type=jnp.float32)

    # Stage 1: relu(bn1(conv1(x)))
    build_taps(x_ref[0])
    y1 = jnp.maximum(conv3x3(w1_ref) + b_ref[0], 0.0)        # (Cout, HW) f32

    # Stage 2: relu(bn2(conv2(y1)) + x)   (residual = x, downsample=None)
    build_taps(y1)
    y2 = conv3x3(w2_ref) + b_ref[1] + x_ref[0].astype(jnp.float32)
    o_ref[0] = jnp.maximum(y2, 0.0).astype(o_ref.dtype)


def _fold_bn_scale_bias(conv_bias, gamma, beta, mean, var, eps):
    scale = gamma * jax.lax.rsqrt(var + eps)
    bias = (conv_bias - mean) * scale + beta
    return scale, bias


def _pack_weights(w_oihw, scale, cp, dtype):
    """(Cout, Cin, 3, 3) torch layout -> (Cout, 9*cp) with BN scale folded.

    Cin zero-padded to cp; K index = (ky*3 + kx)*cp + cin, matching the
    (dy, dx) block order built in the kernel's im2col scratch.
    """
    cout, cin, _, _ = w_oihw.shape
    w = w_oihw * scale[:, None, None, None]
    w = jnp.transpose(w, (0, 2, 3, 1))                # (Cout, ky, kx, Cin)
    w = jnp.pad(w, ((0, 0), (0, 0), (0, 0), (0, cp - cin)))
    return w.reshape(cout, 9 * cp).astype(dtype)


@functools.partial(jax.jit, static_argnames=("compute_dtype",))
def residual_block_forward(x_nchw, params, compute_dtype=jnp.bfloat16):
    """ResidualBlock.forward (stride=1, downsample=None, eval-mode BN)."""
    (w1, b1, g1, be1, m1, v1, w2, b2, g2, be2, m2, v2) = params
    eps = 1e-5

    N, C, H, W = x_nchw.shape
    Cout = w1.shape[0]
    assert Cout == C and w2.shape[0] == C, "downsample=None requires in==out channels"
    HW = H * W
    CP = _round_up(C, _sublane_tile(compute_dtype))   # dtype-tile aligned Cin rows
    PADL = _round_up(W + 1, 128)                      # lane-aligned vertical halo

    s1, bias1 = _fold_bn_scale_bias(b1, g1, be1, m1, v1, eps)
    s2, bias2 = _fold_bn_scale_bias(b2, g2, be2, m2, v2, eps)
    w1p = _pack_weights(w1, s1, CP, compute_dtype)
    w2p = _pack_weights(w2, s2, CP, compute_dtype)
    biases = jnp.stack([bias1, bias2], axis=0)[:, :, None].astype(jnp.float32)

    wpos = jnp.arange(HW, dtype=jnp.int32) % W
    masks = jnp.stack([wpos > 0, wpos < W - 1], axis=0).astype(compute_dtype)

    x_flat = x_nchw.reshape(N, C, HW)    # free: NCHW is already channel-major

    kernel = functools.partial(_resblock_kernel, W=W, CP=CP, PADL=PADL,
                               cdtype=compute_dtype)

    xbytes = x_nchw.dtype.itemsize
    cbytes = jnp.dtype(compute_dtype).itemsize
    flops = 2 * (2 * 9 * C) * Cout * HW * N                 # two conv stages
    bytes_accessed = (N * HW * (C + Cout) * xbytes           # input + output
                      + 2 * Cout * 9 * CP * cbytes           # folded weights
                      + 2 * Cout * 4 + 2 * HW * cbytes)      # biases + masks

    # Explicit VMEM budget: double-buffered in/out/weight/bias/mask blocks,
    # the two scratches, plus headroom for the f32 temporaries (y1, matmul
    # results, epilogue) — with 2x slack, floored at 32 MiB.
    vmem_bytes = (2 * (C + Cout) * HW * xbytes
                  + 2 * 2 * Cout * 9 * CP * cbytes
                  + 2 * (2 * Cout * 4 + 2 * HW * cbytes)
                  + CP * (HW + 2 * PADL) * cbytes
                  + 9 * CP * HW * cbytes
                  + 6 * Cout * HW * 4)
    vmem_limit = int(min(100 * 2 ** 20, max(32 * 2 ** 20, 2 * vmem_bytes)))

    out = pl.pallas_call(
        kernel,
        out_shape=jax.ShapeDtypeStruct((N, Cout, HW), x_nchw.dtype),
        grid=(N,),
        in_specs=[
            pl.BlockSpec((1, C, HW), lambda n: (n, 0, 0)),
            pl.BlockSpec((Cout, 9 * CP), lambda n: (0, 0)),
            pl.BlockSpec((Cout, 9 * CP), lambda n: (0, 0)),
            pl.BlockSpec((2, Cout, 1), lambda n: (0, 0, 0)),
            pl.BlockSpec((2, HW), lambda n: (0, 0)),
        ],
        out_specs=pl.BlockSpec((1, Cout, HW), lambda n: (n, 0, 0)),
        scratch_shapes=[
            pltpu.VMEM((CP, HW + 2 * PADL), compute_dtype),   # stage src + halo
            pltpu.VMEM((9 * CP, HW), compute_dtype),          # aligned im2col
        ],
        compiler_params=pltpu.CompilerParams(
            dimension_semantics=("parallel",),
            vmem_limit_bytes=vmem_limit),
        cost_estimate=pl.CostEstimate(flops=flops, transcendentals=0,
                                      bytes_accessed=bytes_accessed),
    )(x_flat, w1p, w2p, biases, masks)

    return out.reshape(N, Cout, H, W)


# ----------------------------- reference (pure JAX) -----------------------------
def _ref_forward(x_nchw, params, eps=1e-5):
    (w1, b1, g1, be1, m1, v1, w2, b2, g2, be2, m2, v2) = params

    def conv3x3(x, w, b):
        y = jax.lax.conv_general_dilated(
            x, w, window_strides=(1, 1), padding=((1, 1), (1, 1)),
            dimension_numbers=("NCHW", "OIHW", "NCHW"))
        return y + b[None, :, None, None]

    def bn(x, g, be, m, v):
        s = g / jnp.sqrt(v + eps)
        return x * s[None, :, None, None] + (be - m * s)[None, :, None, None]

    out = jax.nn.relu(bn(conv3x3(x_nchw, w1, b1), g1, be1, m1, v1))
    out = bn(conv3x3(out, w2, b2), g2, be2, m2, v2)
    out = out + x_nchw
    return jax.nn.relu(out)


if __name__ == "__main__":
    key = jax.random.PRNGKey(0)
    ks = jax.random.split(key, 13)

    N, C, H, W = 2, 4, 16, 16       # in_channels == out_channels (downsample=None)
    x = jax.random.normal(ks[0], (N, C, H, W), jnp.float32)

    w1 = 0.1 * jax.random.normal(ks[1], (C, C, 3, 3), jnp.float32)
    b1 = 0.1 * jax.random.normal(ks[2], (C,), jnp.float32)
    g1 = 1.0 + 0.1 * jax.random.normal(ks[3], (C,), jnp.float32)
    be1 = 0.1 * jax.random.normal(ks[4], (C,), jnp.float32)
    m1 = 0.1 * jax.random.normal(ks[5], (C,), jnp.float32)
    v1 = 0.5 + jnp.abs(jax.random.normal(ks[6], (C,), jnp.float32))

    w2 = 0.1 * jax.random.normal(ks[7], (C, C, 3, 3), jnp.float32)
    b2 = 0.1 * jax.random.normal(ks[8], (C,), jnp.float32)
    g2 = 1.0 + 0.1 * jax.random.normal(ks[9], (C,), jnp.float32)
    be2 = 0.1 * jax.random.normal(ks[10], (C,), jnp.float32)
    m2 = 0.1 * jax.random.normal(ks[11], (C,), jnp.float32)
    v2 = 0.5 + jnp.abs(jax.random.normal(ks[12], (C,), jnp.float32))

    params = (w1, b1, g1, be1, m1, v1, w2, b2, g2, be2, m2, v2)

    ref = jax.block_until_ready(_ref_forward(x, params))

    # f32 matmul-operand path: strict check against the reference.
    out_f32 = jax.block_until_ready(
        residual_block_forward(x, params, compute_dtype=jnp.float32))
    assert out_f32.shape == (N, C, H, W)
    assert jnp.allclose(out_f32, ref, atol=1e-4, rtol=1e-4), (
        float(jnp.max(jnp.abs(out_f32 - ref))))

    # Default bf16 MXU-operand path (f32 accumulation/epilogue): loose check.
    out_bf16 = jax.block_until_ready(residual_block_forward(x, params))
    assert out_bf16.shape == (N, C, H, W)
    assert jnp.allclose(out_bf16, ref, atol=1e-1, rtol=1e-1), (
        float(jnp.max(jnp.abs(out_bf16 - ref))))

    print("KERNEL_OK")
</pallas_src>

<mosaic_0001>
module attributes {stable_mosaic.version = 11 : i64} {
  func.func @_resblock_kernel(%arg0: i32, %arg1: memref<1x4x256xf32, #tpu.memory_space<vmem>>, %arg2: memref<4x72xf32, #tpu.memory_space<vmem>>, %arg3: memref<4x72xf32, #tpu.memory_space<vmem>>, %arg4: memref<2x4x1xf32, #tpu.memory_space<vmem>>, %arg5: memref<2x256xf32, #tpu.memory_space<vmem>>, %arg6: memref<1x4x256xf32, #tpu.memory_space<vmem>>, %arg7: memref<8x512xf32, #tpu.memory_space<vmem>>, %arg8: memref<72x256xf32, #tpu.memory_space<vmem>>) attributes {dimension_semantics = [#tpu.dimension_semantics<parallel>], iteration_bounds = array<i64: 2>, scalar_prefetch = 0 : i64, scratch_operands = 2 : i64, tpu.core_type = #tpu.core_type<tc>, window_params = [{transform_indices = @transform_0, window_bounds = array<i64: 1, 4, 256>}, {pipeline_mode = #tpu.pipeline_mode<synchronous>, transform_indices = @transform_1, window_bounds = array<i64: 4, 72>}, {pipeline_mode = #tpu.pipeline_mode<synchronous>, transform_indices = @transform_2, window_bounds = array<i64: 4, 72>}, {pipeline_mode = #tpu.pipeline_mode<synchronous>, transform_indices = @transform_3, window_bounds = array<i64: 2, 4, 1>}, {pipeline_mode = #tpu.pipeline_mode<synchronous>, transform_indices = @transform_4, window_bounds = array<i64: 2, 256>}, {transform_indices = @transform_5, window_bounds = array<i64: 1, 4, 256>}]} {
    %cst = arith.constant 0.000000e+00 : f32
    %0 = vector.broadcast %cst : f32 to vector<8x128xf32>
    %c0 = arith.constant 0 : index
    %c0_0 = arith.constant 0 : index
    %1 = vector.load %arg7[%c0, %c0_0] : memref<8x512xf32, #tpu.memory_space<vmem>>, vector<8x128xf32>
    tpu.vector_store %arg7[%c0, %c0_0], %0 {strides = array<i32>} : memref<8x512xf32, #tpu.memory_space<vmem>>, vector<8x128xf32>,
    %cst_1 = arith.constant 0.000000e+00 : f32
    %2 = vector.broadcast %cst_1 : f32 to vector<8x128xf32>
    %c0_2 = arith.constant 0 : index
    %c384 = arith.constant 384 : index
    %3 = vector.load %arg7[%c0_2, %c384] : memref<8x512xf32, #tpu.memory_space<vmem>>, vector<8x128xf32>
    tpu.vector_store %arg7[%c0_2, %c384], %2 {strides = array<i32>} : memref<8x512xf32, #tpu.memory_space<vmem>>, vector<8x128xf32>,
    %cst_3 = arith.constant 0.000000e+00 : f32
    %4 = vector.broadcast %cst_3 : f32 to vector<4x256xf32>
    %c4 = arith.constant 4 : index
    %c0_4 = arith.constant 0 : index
    %5 = vector.load %arg8[%c4, %c0_4] : memref<72x256xf32, #tpu.memory_space<vmem>>, vector<4x256xf32>
    tpu.vector_store %arg8[%c4, %c0_4], %4 {strides = array<i32>} : memref<72x256xf32, #tpu.memory_space<vmem>>, vector<4x256xf32>,
    %cst_5 = arith.constant 0.000000e+00 : f32
    %6 = vector.broadcast %cst_5 : f32 to vector<4x256xf32>
    %c12 = arith.constant 12 : index
    %c0_6 = arith.constant 0 : index
    %7 = vector.load %arg8[%c12, %c0_6] : memref<72x256xf32, #tpu.memory_space<vmem>>, vector<4x256xf32>
    tpu.vector_store %arg8[%c12, %c0_6], %6 {strides = array<i32>} : memref<72x256xf32, #tpu.memory_space<vmem>>, vector<4x256xf32>,
    %cst_7 = arith.constant 0.000000e+00 : f32
    %8 = vector.broadcast %cst_7 : f32 to vector<4x256xf32>
    %c20 = arith.constant 20 : index
    %c0_8 = arith.constant 0 : index
    %9 = vector.load %arg8[%c20, %c0_8] : memref<72x256xf32, #tpu.memory_space<vmem>>, vector<4x256xf32>
    tpu.vector_store %arg8[%c20, %c0_8], %8 {strides = array<i32>} : memref<72x256xf32, #tpu.memory_space<vmem>>, vector<4x256xf32>,
    %cst_9 = arith.constant 0.000000e+00 : f32
    %10 = vector.broadcast %cst_9 : f32 to vector<4x256xf32>
    %c28 = arith.constant 28 : index
    %c0_10 = arith.constant 0 : index
    %11 = vector.load %arg8[%c28, %c0_10] : memref<72x256xf32, #tpu.memory_space<vmem>>, vector<4x256xf32>
    tpu.vector_store %arg8[%c28, %c0_10], %10 {strides = array<i32>} : memref<72x256xf32, #tpu.memory_space<vmem>>, vector<4x256xf32>,
    %cst_11 = arith.constant 0.000000e+00 : f32
    %12 = vector.broadcast %cst_11 : f32 to vector<4x256xf32>
    %c36 = arith.constant 36 : index
    %c0_12 = arith.constant 0 : index
    %13 = vector.load %arg8[%c36, %c0_12] : memref<72x256xf32, #tpu.memory_space<vmem>>, vector<4x256xf32>
    tpu.vector_store %arg8[%c36, %c0_12], %12 {strides = array<i32>} : memref<72x256xf32, #tpu.memory_space<vmem>>, vector<4x256xf32>,
    %cst_13 = arith.constant 0.000000e+00 : f32
    %14 = vector.broadcast %cst_13 : f32 to vector<4x256xf32>
    %c44 = arith.constant 44 : index
    %c0_14 = arith.constant 0 : index
    %15 = vector.load %arg8[%c44, %c0_14] : memref<72x256xf32, #tpu.memory_space<vmem>>, vector<4x256xf32>
    tpu.vector_store %arg8[%c44, %c0_14], %14 {strides = array<i32>} : memref<72x256xf32, #tpu.memory_space<vmem>>, vector<4x256xf32>,
    %cst_15 = arith.constant 0.000000e+00 : f32
    %16 = vector.broadcast %cst_15 : f32 to vector<4x256xf32>
    %c52 = arith.constant 52 : index
    %c0_16 = arith.constant 0 : index
    %17 = vector.load %arg8[%c52, %c0_16] : memref<72x256xf32, #tpu.memory_space<vmem>>, vector<4x256xf32>
    tpu.vector_store %arg8[%c52, %c0_16], %16 {strides = array<i32>} : memref<72x256xf32, #tpu.memory_space<vmem>>, vector<4x256xf32>,
    %cst_17 = arith.constant 0.000000e+00 : f32
    %18 = vector.broadcast %cst_17 : f32 to vector<4x256xf32>
    %c60 = arith.constant 60 : index
    %c0_18 = arith.constant 0 : index
    %19 = vector.load %arg8[%c60, %c0_18] : memref<72x256xf32, #tpu.memory_space<vmem>>, vector<4x256xf32>
    tpu.vector_store %arg8[%c60, %c0_18], %18 {strides = array<i32>} : memref<72x256xf32, #tpu.memory_space<vmem>>, vector<4x256xf32>,
    %cst_19 = arith.constant 0.000000e+00 : f32
    %20 = vector.broadcast %cst_19 : f32 to vector<4x256xf32>
    %c68 = arith.constant 68 : index
    %c0_20 = arith.constant 0 : index
    %21 = vector.load %arg8[%c68, %c0_20] : memref<72x256xf32, #tpu.memory_space<vmem>>, vector<4x256xf32>
    tpu.vector_store %arg8[%c68, %c0_20], %20 {strides = array<i32>} : memref<72x256xf32, #tpu.memory_space<vmem>>, vector<4x256xf32>,
    %c0_21 = arith.constant 0 : index
    %c0_22 = arith.constant 0 : index
    %22 = vector.load %arg5[%c0_21, %c0_22] : memref<2x256xf32, #tpu.memory_space<vmem>>, vector<1x256xf32>
    %c1 = arith.constant 1 : index
    %c0_23 = arith.constant 0 : index
    %23 = vector.load %arg5[%c1, %c0_23] : memref<2x256xf32, #tpu.memory_space<vmem>>, vector<1x256xf32>
    %c0_24 = arith.constant 0 : index
    %c0_25 = arith.constant 0 : index
    %c0_26 = arith.constant 0 : index
    %24 = vector.load %arg1[%c0_24, %c0_25, %c0_26] : memref<1x4x256xf32, #tpu.memory_space<vmem>>, vector<1x4x256xf32>
    %25 = vector.shape_cast %24 : vector<1x4x256xf32> to vector<4x256xf32>
    %c0_27 = arith.constant 0 : index
    %c128 = arith.constant 128 : index
    %26 = vector.load %arg7[%c0_27, %c128] : memref<8x512xf32, #tpu.memory_space<vmem>>, vector<4x256xf32>
    tpu.vector_store %arg7[%c0_27, %c128], %25 {strides = array<i32>} : memref<8x512xf32, #tpu.memory_space<vmem>>, vector<4x256xf32>,
    %c0_28 = arith.constant 0 : index
    %c111 = arith.constant 111 : index
    %27 = vector.load %arg7[%c0_28, %c111] : memref<8x512xf32, #tpu.memory_space<vmem>>, vector<4x256xf32>
    %28 = vector.broadcast %22 : vector<1x256xf32> to vector<4x256xf32>
    %29 = arith.mulf %27, %28 : vector<4x256xf32>
    %c0_29 = arith.constant 0 : index
    %c0_30 = arith.constant 0 : index
    %30 = vector.load %arg8[%c0_29, %c0_30] : memref<72x256xf32, #tpu.memory_space<vmem>>, vector<4x256xf32>
    tpu.vector_store %arg8[%c0_29, %c0_30], %29 {strides = array<i32>} : memref<72x256xf32, #tpu.memory_space<vmem>>, vector<4x256xf32>,
    %c0_31 = arith.constant 0 : index
    %c112 = arith.constant 112 : index
    %31 = vector.load %arg7[%c0_31, %c112] : memref<8x512xf32, #tpu.memory_space<vmem>>, vector<4x256xf32>
    %c8 = arith.constant 8 : index
    %c0_32 = arith.constant 0 : index
    %32 = vector.load %arg8[%c8, %c0_32] : memref<72x256xf32, #tpu.memory_space<vmem>>, vector<4x256xf32>
    tpu.vector_store %arg8[%c8, %c0_32], %31 {strides = array<i32>} : memref<72x256xf32, #tpu.memory_space<vmem>>, vector<4x256xf32>,
    %c0_33 = arith.constant 0 : index
    %c113 = arith.constant 113 : index
    %33 = vector.load %arg7[%c0_33, %c113] : memref<8x512xf32, #tpu.memory_space<vmem>>, vector<4x256xf32>
    %34 = vector.broadcast %23 : vector<1x256xf32> to vector<4x256xf32>
    %35 = arith.mulf %33, %34 : vector<4x256xf32>
    %c16 = arith.constant 16 : index
    %c0_34 = arith.constant 0 : index
    %36 = vector.load %arg8[%c16, %c0_34] : memref<72x256xf32, #tpu.memory_space<vmem>>, vector<4x256xf32>
    tpu.vector_store %arg8[%c16, %c0_34], %35 {strides = array<i32>} : memref<72x256xf32, #tpu.memory_space<vmem>>, vector<4x256xf32>,
    %c0_35 = arith.constant 0 : index
    %c127 = arith.constant 127 : index
    %37 = vector.load %arg7[%c0_35, %c127] : memref<8x512xf32, #tpu.memory_space<vmem>>, vector<4x256xf32>
    %38 = vector.broadcast %22 : vector<1x256xf32> to vector<4x256xf32>
    %39 = arith.mulf %37, %38 : vector<4x256xf32>
    %c24 = arith.constant 24 : index
    %c0_36 = arith.constant 0 : index
    %40 = vector.load %arg8[%c24, %c0_36] : memref<72x256xf32, #tpu.memory_space<vmem>>, vector<4x256xf32>
    tpu.vector_store %arg8[%c24, %c0_36], %39 {strides = array<i32>} : memref<72x256xf32, #tpu.memory_space<vmem>>, vector<4x256xf32>,
    %c32 = arith.constant 32 : index
    %c0_37 = arith.constant 0 : index
    %41 = vector.load %arg8[%c32, %c0_37] : memref<72x256xf32, #tpu.memory_space<vmem>>, vector<4x256xf32>
    tpu.vector_store %arg8[%c32, %c0_37], %25 {strides = array<i32>} : memref<72x256xf32, #tpu.memory_space<vmem>>, vector<4x256xf32>,
    %c0_38 = arith.constant 0 : index
    %c129 = arith.constant 129 : index
    %42 = vector.load %arg7[%c0_38, %c129] : memref<8x512xf32, #tpu.memory_space<vmem>>, vector<4x256xf32>
    %43 = vector.broadcast %23 : vector<1x256xf32> to vector<4x256xf32>
    %44 = arith.mulf %42, %43 : vector<4x256xf32>
    %c40 = arith.constant 40 : index
    %c0_39 = arith.constant 0 : index
    %45 = vector.load %arg8[%c40, %c0_39] : memref<72x256xf32, #tpu.memory_space<vmem>>, vector<4x256xf32>
    tpu.vector_store %arg8[%c40, %c0_39], %44 {strides = array<i32>} : memref<72x256xf32, #tpu.memory_space<vmem>>, vector<4x256xf32>,
    %c0_40 = arith.constant 0 : index
    %c143 = arith.constant 143 : index
    %46 = vector.load %arg7[%c0_40, %c143] : memref<8x512xf32, #tpu.memory_space<vmem>>, vector<4x256xf32>
    %47 = vector.broadcast %22 : vector<1x256xf32> to vector<4x256xf32>
    %48 = arith.mulf %46, %47 : vector<4x256xf32>
    %c48 = arith.constant 48 : index
    %c0_41 = arith.constant 0 : index
    %49 = vector.load %arg8[%c48, %c0_41] : memref<72x256xf32, #tpu.memory_space<vmem>>, vector<4x256xf32>
    tpu.vector_store %arg8[%c48, %c0_41], %48 {strides = array<i32>} : memref<72x256xf32, #tpu.memory_space<vmem>>, vector<4x256xf32>,
    %c0_42 = arith.constant 0 : index
    %c144 = arith.constant 144 : index
    %50 = vector.load %arg7[%c0_42, %c144] : memref<8x512xf32, #tpu.memory_space<vmem>>, vector<4x256xf32>
    %c56 = arith.constant 56 : index
    %c0_43 = arith.constant 0 : index
    %51 = vector.load %arg8[%c56, %c0_43] : memref<72x256xf32, #tpu.memory_space<vmem>>, vector<4x256xf32>
    tpu.vector_store %arg8[%c56, %c0_43], %50 {strides = array<i32>} : memref<72x256xf32, #tpu.memory_space<vmem>>, vector<4x256xf32>,
    %c0_44 = arith.constant 0 : index
    %c145 = arith.constant 145 : index
    %52 = vector.load %arg7[%c0_44, %c145] : memref<8x512xf32, #tpu.memory_space<vmem>>, vector<4x256xf32>
    %53 = vector.broadcast %23 : vector<1x256xf32> to vector<4x256xf32>
    %54 = arith.mulf %52, %53 : vector<4x256xf32>
    %c64 = arith.constant 64 : index
    %c0_45 = arith.constant 0 : index
    %55 = vector.load %arg8[%c64, %c0_45] : memref<72x256xf32, #tpu.memory_space<vmem>>, vector<4x256xf32>
    tpu.vector_store %arg8[%c64, %c0_45], %54 {strides = array<i32>} : memref<72x256xf32, #tpu.memory_space<vmem>>, vector<4x256xf32>,
    %c0_46 = arith.constant 0 : index
    %c0_47 = arith.constant 0 : index
    %56 = vector.load %arg2[%c0_46, %c0_47] : memref<4x72xf32, #tpu.memory_space<vmem>>, vector<4x72xf32>
    %c0_48 = arith.constant 0 : index
    %c0_49 = arith.constant 0 : index
    %57 = vector.load %arg8[%c0_48, %c0_49] : memref<72x256xf32, #tpu.memory_space<vmem>>, vector<72x256xf32>
    %cst_50 = arith.constant dense<0.000000e+00> : vector<4x256xf32>
    %58 = tpu.matmul %56, %57, %cst_50 {dimension_numbers = #tpu.dot_dimension_numbers<[1], [0], [0], [1], [0, 0, 1, 1], [], []>} : vector<4x72xf32>, vector<72x256xf32>, vector<4x256xf32> -> vector<4x256xf32>
    %c0_51 = arith.constant 0 : index
    %c0_52 = arith.constant 0 : index
    %c0_53 = arith.constant 0 : index
    %59 = vector.load %arg4[%c0_51, %c0_52, %c0_53] : memref<2x4x1xf32, #tpu.memory_space<vmem>>, vector<1x4x1xf32>
    %60 = vector.shape_cast %59 : vector<1x4x1xf32> to vector<4x1xf32>
    %61 = vector.broadcast %60 : vector<4x1xf32> to vector<4x256xf32>
    %62 = arith.addf %58, %61 : vector<4x256xf32>
    %cst_54 = arith.constant 0.000000e+00 : f32
    %63 = vector.broadcast %cst_54 : f32 to vector<4x256xf32>
    %64 = arith.maximumf %62, %63 : vector<4x256xf32>
    %c0_55 = arith.constant 0 : index
    %c128_56 = arith.constant 128 : index
    %65 = vector.load %arg7[%c0_55, %c128_56] : memref<8x512xf32, #tpu.memory_space<vmem>>, vector<4x256xf32>
    tpu.vector_store %arg7[%c0_55, %c128_56], %64 {strides = array<i32>} : memref<8x512xf32, #tpu.memory_space<vmem>>, vector<4x256xf32>,
    %c0_57 = arith.constant 0 : index
    %c111_58 = arith.constant 111 : index
    %66 = vector.load %arg7[%c0_57, %c111_58] : memref<8x512xf32, #tpu.memory_space<vmem>>, vector<4x256xf32>
    %67 = vector.broadcast %22 : vector<1x256xf32> to vector<4x256xf32>
    %68 = arith.mulf %66, %67 : vector<4x256xf32>
    %c0_59 = arith.constant 0 : index
    %c0_60 = arith.constant 0 : index
    %69 = vector.load %arg8[%c0_59, %c0_60] : memref<72x256xf32, #tpu.memory_space<vmem>>, vector<4x256xf32>
    tpu.vector_store %arg8[%c0_59, %c0_60], %68 {strides = array<i32>} : memref<72x256xf32, #tpu.memory_space<vmem>>, vector<4x256xf32>,
    %c0_61 = arith.constant 0 : index
    %c112_62 = arith.constant 112 : index
    %70 = vector.load %arg7[%c0_61, %c112_62] : memref<8x512xf32, #tpu.memory_space<vmem>>, vector<4x256xf32>
    %c8_63 = arith.constant 8 : index
    %c0_64 = arith.constant 0 : index
    %71 = vector.load %arg8[%c8_63, %c0_64] : memref<72x256xf32, #tpu.memory_space<vmem>>, vector<4x256xf32>
    tpu.vector_store %arg8[%c8_63, %c0_64], %70 {strides = array<i32>} : memref<72x256xf32, #tpu.memory_space<vmem>>, vector<4x256xf32>,
    %c0_65 = arith.constant 0 : index
    %c113_66 = arith.constant 113 : index
    %72 = vector.load %arg7[%c0_65, %c113_66] : memref<8x512xf32, #tpu.memory_space<vmem>>, vector<4x256xf32>
    %73 = vector.broadcast %23 : vector<1x256xf32> to vector<4x256xf32>
    %74 = arith.mulf %72, %73 : vector<4x256xf32>
    %c16_67 = arith.constant 16 : index
    %c0_68 = arith.constant 0 : index
    %75 = vector.load %arg8[%c16_67, %c0_68] : memref<72x256xf32, #tpu.memory_space<vmem>>, vector<4x256xf32>
    tpu.vector_store %arg8[%c16_67, %c0_68], %74 {strides = array<i32>} : memref<72x256xf32, #tpu.memory_space<vmem>>, vector<4x256xf32>,
    %c0_69 = arith.constant 0 : index
    %c127_70 = arith.constant 127 : index
    %76 = vector.load %arg7[%c0_69, %c127_70] : memref<8x512xf32, #tpu.memory_space<vmem>>, vector<4x256xf32>
    %77 = vector.broadcast %22 : vector<1x256xf32> to vector<4x256xf32>
    %78 = arith.mulf %76, %77 : vector<4x256xf32>
    %c24_71 = arith.constant 24 : index
    %c0_72 = arith.constant 0 : index
    %79 = vector.load %arg8[%c24_71, %c0_72] : memref<72x256xf32, #tpu.memory_space<vmem>>, vector<4x256xf32>
    tpu.vector_store %arg8[%c24_71, %c0_72], %78 {strides = array<i32>} : memref<72x256xf32, #tpu.memory_space<vmem>>, vector<4x256xf32>,
    %c32_73 = arith.constant 32 : index
    %c0_74 = arith.constant 0 : index
    %80 = vector.load %arg8[%c32_73, %c0_74] : memref<72x256xf32, #tpu.memory_space<vmem>>, vector<4x256xf32>
    tpu.vector_store %arg8[%c32_73, %c0_74], %64 {strides = array<i32>} : memref<72x256xf32, #tpu.memory_space<vmem>>, vector<4x256xf32>,
    %c0_75 = arith.constant 0 : index
    %c129_76 = arith.constant 129 : index
    %81 = vector.load %arg7[%c0_75, %c129_76] : memref<8x512xf32, #tpu.memory_space<vmem>>, vector<4x256xf32>
    %82 = vector.broadcast %23 : vector<1x256xf32> to vector<4x256xf32>
    %83 = arith.mulf %81, %82 : vector<4x256xf32>
    %c40_77 = arith.constant 40 : index
    %c0_78 = arith.constant 0 : index
    %84 = vector.load %arg8[%c40_77, %c0_78] : memref<72x256xf32, #tpu.memory_space<vmem>>, vector<4x256xf32>
    tpu.vector_store %arg8[%c40_77, %c0_78], %83 {strides = array<i32>} : memref<72x256xf32, #tpu.memory_space<vmem>>, vector<4x256xf32>,
    %c0_79 = arith.constant 0 : index
    %c143_80 = arith.constant 143 : index
    %85 = vector.load %arg7[%c0_79, %c143_80] : memref<8x512xf32, #tpu.memory_space<vmem>>, vector<4x256xf32>
    %86 = vector.broadcast %22 : vector<1x256xf32> to vector<4x256xf32>
    %87 = arith.mulf %85, %86 : vector<4x256xf32>
    %c48_81 = arith.constant 48 : index
    %c0_82 = arith.constant 0 : index
    %88 = vector.load %arg8[%c48_81, %c0_82] : memref<72x256xf32, #tpu.memory_space<vmem>>, vector<4x256xf32>
    tpu.vector_store %arg8[%c48_81, %c0_82], %87 {strides = array<i32>} : memref<72x256xf32, #tpu.memory_space<vmem>>, vector<4x256xf32>,
    %c0_83 = arith.constant 0 : index
    %c144_84 = arith.constant 144 : index
    %89 = vector.load %arg7[%c0_83, %c144_84] : memref<8x512xf32, #tpu.memory_space<vmem>>, vector<4x256xf32>
    %c56_85 = arith.constant 56 : index
    %c0_86 = arith.constant 0 : index
    %90 = vector.load %arg8[%c56_85, %c0_86] : memref<72x256xf32, #tpu.memory_space<vmem>>, vector<4x256xf32>
    tpu.vector_store %arg8[%c56_85, %c0_86], %89 {strides = array<i32>} : memref<72x256xf32, #tpu.memory_space<vmem>>, vector<4x256xf32>,
    %c0_87 = arith.constant 0 : index
    %c145_88 = arith.constant 145 : index
    %91 = vector.load %arg7[%c0_87, %c145_88] : memref<8x512xf32, #tpu.memory_space<vmem>>, vector<4x256xf32>
    %92 = vector.broadcast %23 : vector<1x256xf32> to vector<4x256xf32>
    %93 = arith.mulf %91, %92 : vector<4x256xf32>
    %c64_89 = arith.constant 64 : index
    %c0_90 = arith.constant 0 : index
    %94 = vector.load %arg8[%c64_89, %c0_90] : memref<72x256xf32, #tpu.memory_space<vmem>>, vector<4x256xf32>
    tpu.vector_store %arg8[%c64_89, %c0_90], %93 {strides = array<i32>} : memref<72x256xf32, #tpu.memory_space<vmem>>, vector<4x256xf32>,
    %c0_91 = arith.constant 0 : index
    %c0_92 = arith.constant 0 : index
    %95 = vector.load %arg3[%c0_91, %c0_92] : memref<4x72xf32, #tpu.memory_space<vmem>>, vector<4x72xf32>
    %c0_93 = arith.constant 0 : index
    %c0_94 = arith.constant 0 : index
    %96 = vector.load %arg8[%c0_93, %c0_94] : memref<72x256xf32, #tpu.memory_space<vmem>>, vector<72x256xf32>
    %cst_95 = arith.constant dense<0.000000e+00> : vector<4x256xf32>
    %97 = tpu.matmul %95, %96, %cst_95 {dimension_numbers = #tpu.dot_dimension_numbers<[1], [0], [0], [1], [0, 0, 1, 1], [], []>} : vector<4x72xf32>, vector<72x256xf32>, vector<4x256xf32> -> vector<4x256xf32>
    %c1_96 = arith.constant 1 : index
    %c0_97 = arith.constant 0 : index
    %c0_98 = arith.constant 0 : index
    %98 = vector.load %arg4[%c1_96, %c0_97, %c0_98] : memref<2x4x1xf32, #tpu.memory_space<vmem>>, vector<1x4x1xf32>
    %99 = vector.shape_cast %98 : vector<1x4x1xf32> to vector<4x1xf32>
    %100 = vector.broadcast %99 : vector<4x1xf32> to vector<4x256xf32>
    %101 = arith.addf %97, %100 : vector<4x256xf32>
    %c0_99 = arith.constant 0 : index
    %c0_100 = arith.constant 0 : index
    %c0_101 = arith.constant 0 : index
    %102 = vector.load %arg1[%c0_99, %c0_100, %c0_101] : memref<1x4x256xf32, #tpu.memory_space<vmem>>, vector<1x4x256xf32>
    %103 = vector.shape_cast %102 : vector<1x4x256xf32> to vector<4x256xf32>
    %104 = arith.addf %101, %103 : vector<4x256xf32>
    %cst_102 = arith.constant 0.000000e+00 : f32
    %105 = vector.broadcast %cst_102 : f32 to vector<4x256xf32>
    %106 = arith.maximumf %104, %105 : vector<4x256xf32>
    %c0_103 = arith.constant 0 : index
    %c0_104 = arith.constant 0 : index
    %c0_105 = arith.constant 0 : index
    %107 = vector.load %arg6[%c0_103, %c0_104, %c0_105] : memref<1x4x256xf32, #tpu.memory_space<vmem>>, vector<1x4x256xf32>
    %108 = vector.shape_cast %107 : vector<1x4x256xf32> to vector<4x256xf32>
    %109 = vector.shape_cast %106 : vector<4x256xf32> to vector<1x4x256xf32>
    tpu.vector_store %arg6[%c0_103, %c0_104, %c0_105], %109 {strides = array<i32>} : memref<1x4x256xf32, #tpu.memory_space<vmem>>, vector<1x4x256xf32>,
    return
  }
  func.func @transform_0(%arg0: i32) -> (i32, i32, i32) {
    %c0_i32 = arith.constant 0 : i32
    %c0_i32_0 = arith.constant 0 : i32
    %c0_i32_1 = arith.constant 0 : i32
    return %arg0, %c0_i32, %c0_i32_0 : i32, i32, i32
  }
  func.func @transform_1(%arg0: i32) -> (i32, i32) {
    %c0_i32 = arith.constant 0 : i32
    %c0_i32_0 = arith.constant 0 : i32
    %c0_i32_1 = arith.constant 0 : i32
    return %c0_i32, %c0_i32_0 : i32, i32
  }
  func.func @transform_2(%arg0: i32) -> (i32, i32) {
    %c0_i32 = arith.constant 0 : i32
    %c0_i32_0 = arith.constant 0 : i32
    %c0_i32_1 = arith.constant 0 : i32
    return %c0_i32, %c0_i32_0 : i32, i32
  }
  func.func @transform_3(%arg0: i32) -> (i32, i32, i32) {
    %c0_i32 = arith.constant 0 : i32
    %c0_i32_0 = arith.constant 0 : i32
    %c0_i32_1 = arith.constant 0 : i32
    %c0_i32_2 = arith.constant 0 : i32
    return %c0_i32, %c0_i32_0, %c0_i32_1 : i32, i32, i32
  }
  func.func @transform_4(%arg0: i32) -> (i32, i32) {
    %c0_i32 = arith.constant 0 : i32
    %c0_i32_0 = arith.constant 0 : i32
    %c0_i32_1 = arith.constant 0 : i32
    return %c0_i32, %c0_i32_0 : i32, i32
  }
  func.func @transform_5(%arg0: i32) -> (i32, i32, i32) {
    %c0_i32 = arith.constant 0 : i32
    %c0_i32_0 = arith.constant 0 : i32
    %c0_i32_1 = arith.constant 0 : i32
    return %arg0, %c0_i32, %c0_i32_0 : i32, i32, i32
  }
}

</mosaic_0001>

<bundles_post_ra>
// kernel: residual_block_forward.1
= control target key start
LH: loop header
LB: loop body
LE: loop exit
PB: predicated region body
PF: predicated region fallthrough
CT: control target
= control target key end

     0   :  { %s1045_s18 = smov 0   ;;  %s1291_s0 = inlined_call_operand.vmem [shape: f32[2,4,256], index: 0, kind: input, shape index: {}]   ;;  %s1292_s1 = inlined_call_operand.vmem [shape: f32[4,72], index: 1, kind: input, shape index: {}]   ;;  %s1293_s2 = inlined_call_operand.vmem [shape: f32[4,72], index: 2, kind: input, shape index: {}]   ;;  %s1294_s3 = inlined_call_operand.vmem [shape: f32[2,4,1], index: 3, kind: input, shape index: {}]   ;;  %s1295_s4 = inlined_call_operand.vmem [shape: f32[2,256], index: 4, kind: input, shape index: {}]   ;;  %s1296_s5 = inlined_call_operand.vmem [shape: f32[2,4,256], index: 5, kind: output, shape index: {}]  }
   0x1 LB: > { %s928_s19 = sadd.s32 4294967295, %s1003_s18   ;;  %p932_p0 = scmp.ge.s32.totalorder %s1003_s18, 1  ;;  %s1003_s18 = sphi %s1045_s18, %s15_s18  }
   0x2   : > { %p187_p1 = scmp.lt.s32.totalorder %s1003_s18, 3 }
   0x4   : > { %p188_p2 = pnand %p932_p0, %p187_p1 }
   0x5   : > { %v258_v0 = vlaneseq (!%p188_p2)  ;;  %v1005_v1 = vmov (!%p188_p2), 0.0   ;;  %v937_v2 = vld [vmem:[%s1295_s4 + $0x1] ss:$2 sm:$0x3] (!%p188_p2)  ;;  %p215_p3 = scmp.lt.s32.totalorder (!%p188_p2), %s928_s19, 1  ;;  %s1006_s25 = smov (!%p188_p2), 113  }
   0x6   : > { %191 = sbr.rel (%p188_p2) target bundleno = 909 (0x38d), region = 40  ;;  %225 = vst [vmem:[#allocation2] sm:$0xff] (!%p188_p2), %v1005_v1  ;;  %226 = vst [vmem:[#allocation2 + $0x18] sm:$0xff] (!%p188_p2), %v1005_v1  ;;  %585 = vmatprep.mubr.f32.mxu0 (!%p188_p2), %v1005_v1  ;;  %853 = vmatprep.mubr.f32.mxu1 (!%p188_p2), %v1005_v1  ;;  %v245_v4 = vld [vmem:[%s1295_s4] ss:$2 sm:$0x3] (!%p188_p2) }
   0x7   : > { %227 = vst [vmem:[#allocation3] sm:$0xf0] (!%p188_p2), %v1005_v1  ;;  %228 = vst [vmem:[#allocation3 + $0x8] sm:$0xf0] (!%p188_p2), %v1005_v1  ;;  %v259_v3 = vshrl.u32 (!%p188_p2), %v258_v0, 7  ;;  %s1007_s26 = smov (!%p188_p2), 111  }
   0x8   : > { %229 = vst [vmem:[#allocation3 + $0x10] sm:$0xf0] (!%p188_p2), %v1005_v1  ;;  %230 = vst [vmem:[#allocation3 + $0x18] sm:$0xf0] (!%p188_p2), %v1005_v1  ;;  %s1008_s30 = smov (!%p188_p2), 127   ;;  %s1009_s6 = smov (!%p188_p2), 1  }
   0x9   : > { %231 = vst [vmem:[#allocation3 + $0x20] sm:$0xf0] (!%p188_p2), %v1005_v1  ;;  %232 = vst [vmem:[#allocation3 + $0x28] sm:$0xf0] (!%p188_p2), %v1005_v1  ;;  %v260_v5 = vsub.s32 (!%p188_p2), 0, %v259_v3  ;;  %v264_v6 = vsub.s32 (!%p188_p2), 1, %v259_v3 }
   0xa   : > { %233 = vst [vmem:[#allocation3 + $0x30] sm:$0xf0] (!%p188_p2), %v1005_v1  ;;  %234 = vst [vmem:[#allocation3 + $0x38] sm:$0xf0] (!%p188_p2), %v1005_v1  ;;  %s1010_s7 = smov (!%p188_p2), 15   ;;  %s1011_s8 = smov (!%p188_p2), 17  }
   0xb   : > { %235 = vst [vmem:[#allocation3 + $0x40] sm:$0xf0] (!%p188_p2), %v1005_v1  ;;  %236 = vst [vmem:[#allocation3 + $0x48] sm:$0xf0] (!%p188_p2), %v1005_v1  ;;  %v320_v7 = vrot.slane (!%p188_p2), %v937_v2, %v260_v5  ;;  %v261_v8 = vrot.slane (!%p188_p2), %v245_v4, %v260_v5  ;;  %v324_v9 = vrot.slane (!%p188_p2), %v937_v2, %v264_v6  ;;  %s1012_s9 = smov (!%p188_p2), 16   ;;  %s1013_s10 = smov (!%p188_p2), 112  }
   0xc   : > { %237 = vst [vmem:[#allocation3 + $0x50] sm:$0xf0] (!%p188_p2), %v1005_v1  ;;  %238 = vst [vmem:[#allocation3 + $0x58] sm:$0xf0] (!%p188_p2), %v1005_v1  ;;  %v265_v10 = vrot.slane (!%p188_p2), %v245_v4, %v264_v6  ;;  %v1014_v17 = vmov (!%p188_p2), 0   ;;  %vm270_vm0 = vcmask (!%p188_p2), 908288  }
   0xd   : > { %239 = vst [vmem:[#allocation3 + $0x60] sm:$0xf0] %v1005_v1  ;;  %240 = vst [vmem:[#allocation3 + $0x68] sm:$0xf0] %v1005_v1  ;;  %s1298_s19 = smov (!%p215_p3, %s928_s19), 1  ;;  %325 = vrot.lane.b32.xlu1 %v320_v7, %s1006_s25  ;;  %266 = vrot.lane.b32.xlu0 %v261_v8, %s1007_s26  ;;  %vm329_vm1 = vcmask 924672  }
   0xe   : > { %241 = vst [vmem:[#allocation3 + $0x70] sm:$0xf0] %v1005_v1  ;;  %242 = vst [vmem:[#allocation3 + $0x78] sm:$0xf0] %v1005_v1  ;;  %s943_s24 = sshll.u32 %s1298_s19, 3  ;;  %995 = vset.pattern.permute.xlu0 %v1014_v17  ;;  %vm306_vm2 = vcmask 130048  }
   0xf   : > { %243 = vst [vmem:[#allocation3 + $0x80] sm:$0xf0] %v1005_v1  ;;  %244 = vst [vmem:[#allocation3 + $0x88] sm:$0xf0] %v1005_v1  ;;  %s219_s29 = scalar_lea.vmem %s1291_s0, %s943_s24  ;;  %v294_v15 = vld [vmem:[#allocation2] sm:$0xf]  ;;  %s224_s23 = scalar_lea.vmem %s1296_s5, %s943_s24 }
  0x10   : > { %v1073_v11 = vld [vmem:[%s219_s29] sm:$0xff]  ;;  %v417_v39 = vld [vmem:[#allocation2 + $0x18] sm:$0xf]  ;;  %vm360_vm3 = vcmask 1039360   ;;  %vm346_vm4 = vcmask 121856   ;;  %vm287_vm5 = vcmask 138240  }
  0x11   : > { %v1077_v12 = vcombine.high %v1073_v11, %v1073_v11  ;;  %252 = vst [vmem:[#allocation2 + $0x8] sm:$0xf] %v1073_v11  ;;  %384 = vst [vmem:[#allocation3 + $0x40] sm:$0xf] %v1073_v11  ;;  %327 = vrot.lane.b32.xlu1 %v324_v9, %s1006_s25  ;;  %268 = vrot.lane.b32.xlu0 %v265_v10, %s1007_s26  ;;  %v254_v18 = vld [vmem:[#allocation2] sm:$0xf] }
  0x12   : > { %v313_v22 = vld [vmem:[#allocation2] sm:$0xf]  ;;  %v388_v45 = vld [vmem:[#allocation2 + $0x18] sm:$0xf]  ;;  %vm377_vm6 = vcmask 7168   ;;  %vm456_vm7 = vcmask 916480  }
  0x13   : > { %253 = vst [vmem:[#allocation2 + $0x10] sm:$0xf] %v1077_v12  ;;  %385 = vst [vmem:[#allocation3 + $0x48] sm:$0xf] %v1077_v12  ;;  %v353_v38 = vld [vmem:[#allocation2] sm:$0xf] }
  0x14   : > { %v465_v17 = vld [vmem:[#allocation2 + $0x18] sm:$0xf]  ;;  %vm517_vm8 = vcmask 588800  }
  0x15   : > { %358 = vrot.lane.b32.xlu1 %v265_v10, %s1008_s30  ;;  %356 = vrot.lane.b32.xlu0 %v261_v8, %s1008_s30 }
  0x18   : > { %v295_v14 = vld [vmem:[#allocation2 + $0x8] sm:$0xf] }
  0x19   : > { %391 = vrot.lane.b32.xlu1 %v324_v9, %s1009_s6  ;;  %389 = vrot.lane.b32.xlu0 %v320_v7, %s1009_s6  ;;  %v386_v33 = vld [vmem:[#allocation2 + $0x8] sm:$0xf] }
  0x1a   : > { %v296_v13 = vld [vmem:[#allocation2 + $0x10] sm:$0xf]  ;;  %v255_v46 = vld [vmem:[#allocation2 + $0x8] sm:$0xf] }
  0x1b   : > { %v445_v16 = vld [vmem:[#allocation2 + $0x10] sm:$0xf]  ;;  %v415_v47 = vld [vmem:[#allocation2 + $0x8] sm:$0xf] }
  0x1c   : > { %v256_v23 = vld [vmem:[#allocation2 + $0x10] sm:$0xf]  ;;  %v314_v53 = vld [vmem:[#allocation2 + $0x8] sm:$0xf] }
  0x1d   : > { %420 = vrot.lane.b32.xlu1 %v265_v10, %s1010_s7  ;;  %418 = vrot.lane.b32.xlu0 %v261_v8, %s1010_s7  ;;  %v315_v28 = vld [vmem:[#allocation2 + $0x10] sm:$0xf]  ;;  %v354_v61 = vld [vmem:[#allocation2 + $0x8] sm:$0xf] }
  0x1e   : > { %v355_v32 = vld [vmem:[#allocation2 + $0x10] sm:$0xf]  ;;  %v463_v8 = vld [vmem:[#allocation2 + $0x8] sm:$0xf] }
  0x1f   : > { %v416_v62 = vld [vmem:[#allocation2 + $0x10] sm:$0xf] }
  0x20   : > { %v464_v0 = vld [vmem:[#allocation2 + $0x10] sm:$0xf] }
  0x21   : > { %468 = vrot.lane.b32.xlu1 %v324_v9, %s1011_s8  ;;  %466 = vrot.lane.b32.xlu0 %v320_v7, %s1011_s8  ;;  %v387_v6 = vld [vmem:[#allocation2 + $0x10] sm:$0xf] }
  0x25   : > { %304 = vrot.lane.b32.xlu1 %v296_v13, %s1012_s9  ;;  %302 = vrot.lane.b32.xlu0 %v295_v14, %s1012_s9  ;;  %v446_v13 = vld [vmem:[#allocation2 + $0x18] sm:$0xf]  ;;  %v444_v14 = vld [vmem:[#allocation2 + $0x8] sm:$0xf] }
  0x29   : > { %300 = vrot.lane.b32.xlu1 %v294_v15, %s1012_s9  ;;  %v617_v15 = vld [vmem:[#allocation2] sm:$0xf] }
  0x2d   : > { %452 = vrot.lane.b32.xlu1 %v445_v16, %s1013_s10  ;;  %v656_v16 = vld [vmem:[#allocation2] sm:$0xf] }
  0x7f   : > { %v1097_v19 = vpop.permute.xlu1 %325  ;;  %v1099_v20 = vpop.permute.xlu0 %266 }
  0x80   : > { %v275_v21 = vmul.f32 %v1099_v20, %v254_v18  ;;  %v334_v26 = vmul.f32 %v1097_v19, %v313_v22  ;;  %v681_v22 = vld [vmem:[#allocation2 + $0x18] sm:$0xf] }
  0x82   : > { %281 = vrot.lane.b32.xlu0 %v275_v21, %s1011_s8 }
  0x83   : > { %v1103_v24 = vpop.permute.xlu1 %327  ;;  %v1105_v25 = vpop.permute.xlu0 %268 }
  0x84   : > { %v277_v27 = vmul.f32 %v1105_v25, %v256_v23  ;;  %v336_v31 = vmul.f32 %v1103_v24, %v315_v28  ;;  %v1134_v44 = vsel %vm270_vm0, %v1099_v20, %v1105_v25  ;;  %v1147_v52 = vsel %vm329_vm1, %v1097_v19, %v1103_v24  ;;  %v511_v23 = vld [vmem:[%s1294_s3] sm:$0xf] }
  0x85   : > { %v276_v51 = vmul.f32 %v1134_v44, %v255_v46  ;;  %v335_v57 = vmul.f32 %v1147_v52, %v314_v53 }
  0x86   : > { %340 = vrot.lane.b32.xlu0 %v334_v26, %s1010_s7  ;;  %285 = vrot.lane.b32.xlu1 %v277_v27, %s1011_s8  ;;  %v596_v27 = vld [vmem:[#allocation2] sm:$0xf] }
  0x87   : > { %v1111_v29 = vpop.permute.xlu1 %358  ;;  %v1113_v30 = vpop.permute.xlu0 %356  ;;  %v599_v28 = vmul.f32 %v596_v27, %v1099_v20  ;;  %v502_v27 = vld [vmem:[#allocation3 + $0x48] sm:$0xff] }
  0x88   : > { %v367_v36 = vmul.f32 %v1111_v29, %v355_v32  ;;  %v365_v42 = vmul.f32 %v1113_v30, %v353_v38  ;;  %v1157_v59 = vsel %vm360_vm3, %v1113_v30, %v1111_v29  ;;  %v659_v18 = vmul.f32 %v656_v16, %v1113_v30  ;;  %v635_v30 = vld [vmem:[#allocation2] sm:$0xf]  ;;  %v702_v32 = vld [vmem:[#allocation2 + $0x18] sm:$0xf] }
  0x89   : > { %v366_v2 = vmul.f32 %v1157_v59, %v354_v61 }
  0x8a   : > { %344 = vrot.lane.b32.xlu1 %v336_v31, %s1010_s7  ;;  %v638_v31 = vmul.f32 %v635_v30, %v1097_v19 }
  0x8b   : > { %v1117_v34 = vpop.permute.xlu1 %391  ;;  %v1119_v35 = vpop.permute.xlu0 %389 }
  0x8c   : > { %v397_v37 = vmul.f32 %v1119_v35, %v386_v33  ;;  %v399_v50 = vmul.f32 %v1117_v34, %v388_v45  ;;  %v1177_v5 = vsel %vm377_vm6, %v1119_v35, %v1117_v34  ;;  %v684_v26 = vmul.f32 %v681_v22, %v1117_v34 }
  0x8d   : > { %v398_v9 = vmul.f32 %v1177_v5, %v387_v6 }
  0x8e   : > { %403 = vrot.lane.b32.xlu0 %v397_v37, %s1008_s30  ;;  %375 = vrot.lane.b32.xlu1 %v367_v36, %s1009_s6 }
  0x8f   : > { %v1125_v40 = vpop.permute.xlu1 %420  ;;  %v1127_v41 = vpop.permute.xlu0 %418 }
  0x90   : > { %v428_v43 = vmul.f32 %v1125_v40, %v417_v39  ;;  %v426_v54 = vmul.f32 %v1127_v41, %v415_v47  ;;  %v1162_v60 = vsel %vm346_vm4, %v1127_v41, %v1125_v40  ;;  %v705_v33 = vmul.f32 %v702_v32, %v1125_v40 }
  0x91   : > { %v427_v3 = vmul.f32 %v1162_v60, %v416_v62 }
  0x92   : > { %436 = vrot.lane.b32.xlu0 %v428_v43, %s1006_s25  ;;  %371 = vrot.lane.b32.xlu1 %v365_v42, %s1009_s6 }
  0x93   : > { %v1138_v48 = vpop.permute.xlu1 %468  ;;  %v1140_v49 = vpop.permute.xlu0 %466 }
  0x94   : > { %v1169_v63 = vsel %vm287_vm5, %v1140_v49, %v1138_v48  ;;  %v474_v10 = vmul.f32 %v1140_v49, %v463_v8  ;;  %v476_v21 = vmul.f32 %v1138_v48, %v465_v17 }
  0x95   : > { %v475_v7 = vmul.f32 %v1169_v63, %v464_v0 }
  0x96   : > { %283 = vrot.lane.b32.xlu0 %v276_v51, %s1011_s8  ;;  %407 = vrot.lane.b32.xlu1 %v399_v50, %s1008_s30 }
  0x97   : > { %v305_v55 = vpop.permute.xlu1 %304  ;;  %v303_v56 = vpop.permute.xlu0 %302 }
  0x98   : > { %v308_v58 = vsel %vm306_vm2, %v303_v56, %v305_v55 }
  0x99   : > { %312 = vst [vmem:[#allocation3 + $0x18] sm:$0xf] %v308_v58 }
  0x9a   : > { %342 = vrot.lane.b32.xlu0 %v335_v57, %s1010_s7  ;;  %432 = vrot.lane.b32.xlu1 %v426_v54, %s1006_s25 }
  0x9b   : > { %v301_v1 = vpop.permute.xlu1 %300 }
  0x9c   : > { %v307_v4 = vsel %vm306_vm2, %v301_v1, %v303_v56 }
  0x9d   : > { %311 = vst [vmem:[#allocation3 + $0x10] sm:$0xf] %v307_v4 }
  0x9e   : > { %373 = vrot.lane.b32.xlu0 %v366_v2, %s1009_s6  ;;  %434 = vrot.lane.b32.xlu1 %v427_v3, %s1006_s25 }
  0x9f   : > { %v1205_v36 = vpop.permute.xlu1 %452 }
  0xa0   : > { %v496_v57 = vld [vmem:[#allocation3 + $0x18] sm:$0xff] }
  0xa2   : > { %405 = vrot.lane.b32.xlu0 %v398_v9, %s1008_s30  ;;  %482 = vrot.lane.b32.xlu1 %v475_v7, %s1007_s26 }
  0xa4   : > { %v495_v3 = vld [vmem:[#allocation3 + $0x10] sm:$0xff] }
  0xa6   : > { %454 = vrot.lane.b32.xlu0 %v446_v13, %s1013_s10  ;;  %480 = vrot.lane.b32.xlu1 %v474_v10, %s1007_s26 }
  0xaa   : > { %450 = vrot.lane.b32.xlu0 %v444_v14, %s1013_s10  ;;  %623 = vrot.lane.b32.xlu1 %v617_v15, %s1012_s9 }
  0xae   : > { %484 = vrot.lane.b32.xlu0 %v476_v21, %s1007_s26  ;;  %665 = vrot.lane.b32.xlu1 %v659_v18, %s1009_s6 }
  0xb2   : > { %514 = vperm.xlu0 %995, %v511_v23   ;;  %692 = vrot.lane.b32.xlu1 %v684_v26, %s1008_s30 }
  0xb6   : > { %605 = vrot.lane.b32.xlu0 %v599_v28, %s1011_s8  ;;  %v501_v28 = vld [vmem:[#allocation3 + $0x40] sm:$0xff] }
  0xba   : > { %644 = vrot.lane.b32.xlu0 %v638_v31, %s1010_s7 }
  0xbe   : > { %713 = vrot.lane.b32.xlu0 %v705_v33, %s1006_s25 }
  0xf4   : > { %v282_v34 = vpop.permute.xlu0 %281 }
  0xf8   : > { %v286_v37 = vpop.permute.xlu1 %285  ;;  %v341_v38 = vpop.permute.xlu0 %340 }
  0xfc   : > { %v345_v39 = vpop.permute.xlu1 %344 }
 0x100   : > { %v404_v42 = vpop.permute.xlu0 %403  ;;  %v376_v20 = vpop.permute.xlu1 %375 }
 0x104   : > { %v437_v43 = vpop.permute.xlu0 %436  ;;  %v372_v45 = vpop.permute.xlu1 %371 }
 0x108   : > { %v284_v46 = vpop.permute.xlu0 %283  ;;  %v408_v47 = vpop.permute.xlu1 %407 }
 0x109   : > { %v288_v19 = vsel %vm287_vm5, %v282_v34, %v284_v46  ;;  %v289_v50 = vsel %vm287_vm5, %v284_v46, %v286_v37 }
 0x10a   : > { %292 = vst [vmem:[#allocation3] sm:$0xf] %v288_v19  ;;  %293 = vst [vmem:[#allocation3 + $0x8] sm:$0xf] %v289_v50  ;;  %v492_v19 = vld [vmem:[%s1292_s1] sm:$0xf] }
 0x10c   : > { %v343_v40 = vpop.permute.xlu0 %342  ;;  %v433_v51 = vpop.permute.xlu1 %432 }
 0x10d   : > { %v347_v53 = vsel %vm346_vm4, %v341_v38, %v343_v40  ;;  %v348_v54 = vsel %vm346_vm4, %v343_v40, %v345_v39 }
 0x10e   : > { %351 = vst [vmem:[#allocation3 + $0x20] sm:$0xf] %v347_v53  ;;  %352 = vst [vmem:[#allocation3 + $0x28] sm:$0xf] %v348_v54 }
 0x110   : > { %v374_v55 = vpop.permute.xlu0 %373  ;;  %v435_v56 = vpop.permute.xlu1 %434 }
 0x111   : > { %v378_v58 = vsel %vm377_vm6, %v372_v45, %v374_v55  ;;  %v379_v61 = vsel %vm377_vm6, %v374_v55, %v376_v20  ;;  %v438_v62 = vsel %vm329_vm1, %v433_v51, %v435_v56  ;;  %v439_v0 = vsel %vm329_vm1, %v435_v56, %v437_v43  ;;  %v494_v1 = vld [vmem:[#allocation3 + $0x8] sm:$0xff]  ;;  %v493_v2 = vld [vmem:[#allocation3] sm:$0xff] }
 0x112   : > { %382 = vst [vmem:[#allocation3 + $0x30] sm:$0xf] %v378_v58  ;;  %383 = vst [vmem:[#allocation3 + $0x38] sm:$0xf] %v379_v61  ;;  %v945_v4 = vpack.c.bf16 %v496_v57, %v494_v1  ;;  %v947_v6 = vpack.c.bf16 %v495_v3, %v493_v2 }
 0x113   : > { %442 = vst [vmem:[#allocation3 + $0x60] sm:$0xf] %v438_v62  ;;  %443 = vst [vmem:[#allocation3 + $0x68] sm:$0xf] %v439_v0 }
 0x114   : > { %v406_v7 = vpop.permute.xlu0 %405  ;;  %946 = vmatprep.subr.bf16.mxu0 %v945_v4  ;;  %v483_v8 = vpop.permute.xlu1 %482 }
 0x115   : > { %v409_v9 = vsel %vm360_vm3, %v404_v42, %v406_v7  ;;  %v410_v10 = vsel %vm360_vm3, %v406_v7, %v408_v47  ;;  %948 = vmatpush1.bf16.msra.mxu0 %v947_v6  ;;  %v498_v15 = vld [vmem:[#allocation3 + $0x28] sm:$0xff]  ;;  %v497_v21 = vld [vmem:[#allocation3 + $0x20] sm:$0xff] }
 0x116   : > { %413 = vst [vmem:[#allocation3 + $0x50] sm:$0xf] %v409_v9  ;;  %414 = vst [vmem:[#allocation3 + $0x58] sm:$0xf] %v410_v10 }
 0x118   : > { %v455_v13 = vpop.permute.xlu0 %454  ;;  %v481_v14 = vpop.permute.xlu1 %480 }
 0x119   : > { %v458_v16 = vsel %vm456_vm7, %v1205_v36, %v455_v13  ;;  %v486_v17 = vsel %vm270_vm0, %v481_v14, %v483_v8  ;;  %v500_v18 = vld [vmem:[#allocation3 + $0x38] sm:$0xff]  ;;  %v499_v22 = vld [vmem:[#allocation3 + $0x30] sm:$0xff] }
 0x11a   : > { %462 = vst [vmem:[#allocation3 + $0x78] sm:$0xf] %v458_v16  ;;  %490 = vst [vmem:[#allocation3 + $0x80] sm:$0xf] %v486_v17  ;;  %v949_v23 = vpack.c.bf16 %v500_v18, %v498_v15  ;;  %v951_v26 = vpack.c.bf16 %v499_v22, %v497_v21  ;;  %v506_v42 = vld [vmem:[#allocation3 + $0x68] sm:$0xff]  ;;  %v505_v45 = vld [vmem:[#allocation3 + $0x60] sm:$0xff] }
 0x11b   : > { %v723_v15 = vld [vmem:[#allocation2 + $0x18] sm:$0xf]  ;;  %v939_v22 = vld [vmem:[%s1294_s3 + $0x4] sm:$0xf] }
 0x11c   : > { %v451_v30 = vpop.permute.xlu0 %450  ;;  %950 = vmatprep.subr.bf16.mxu0 %v949_v23  ;;  %v741_v16 = vld [vmem:[#allocation2 + $0x18] sm:$0xf] }
 0x11d   : > { %v457_v31 = vsel %vm456_vm7, %v451_v30, %v1205_v36  ;;  %952 = vmatpush1.bf16.msra.mxu0 %v951_v26  ;;  %v504_v32 = vld [vmem:[#allocation3 + $0x58] sm:$0xff]  ;;  %v503_v33 = vld [vmem:[#allocation3 + $0x50] sm:$0xff] }
 0x11e   : > { %461 = vst [vmem:[#allocation3 + $0x70] sm:$0xf] %v457_v31  ;;  %v953_v34 = vpack.c.bf16 %v504_v32, %v502_v27  ;;  %v955_v37 = vpack.c.bf16 %v503_v33, %v501_v28 }
 0x120   : > { %v485_v38 = vpop.permute.xlu0 %484  ;;  %954 = vmatprep.subr.bf16.mxu0 %v953_v34 }
 0x121   : > { %v487_v39 = vsel %vm270_vm0, %v483_v8, %v485_v38  ;;  %956 = vmatpush1.bf16.msra.mxu0 %v955_v37  ;;  %v508_v20 = vld [vmem:[#allocation3 + $0x78] sm:$0xff]  ;;  %v509_v50 = vld [vmem:[#allocation3 + $0x80] sm:$0xff] }
 0x122   : > { %491 = vst [vmem:[#allocation3 + $0x88] sm:$0xf] %v487_v39  ;;  %v957_v43 = vpack.c.bf16 %v508_v20, %v506_v42 }
 0x124   : > { %958 = vmatprep.subr.bf16.mxu0 %v957_v43 }
 0x125   : > { %v507_v46 = vld [vmem:[#allocation3 + $0x70] sm:$0xff] }
 0x126   : > { %v959_v47 = vpack.c.bf16 %v507_v46, %v505_v45 }
 0x128   : > { %960 = vmatpush1.bf16.msra.mxu0 %v959_v47 }
 0x129   : > { %v510_v36 = vld [vmem:[#allocation3 + $0x88] sm:$0xff] }
 0x12a   : > { %537 = vmatprep.subr.mxu0 %v510_v36 }
 0x12c   : > { %538 = vmatpush1.msra.mxu0 %v509_v50 }
 0x12d   : > { %938 = vmatmul.mubr.msk.f32.vlgmr.msra.gmra.mrb[0].mxu0 %vm517_vm8, %v492_v19 }
 0x131   : > { %v515_v40 = vpop.permute.xlu0 %514 }
 0x200   : > { %v587_v51 = vpop.f32.mrb[0].mxu0 }
 0x201   : > { %v588_v53 = vadd.f32 %v587_v51, %v515_v40  ;;  %v589_v54 = vpop.f32.mrb[1].mxu0 }
 0x202   : > { %v590_v55 = vadd.f32 %v589_v54, %v515_v40 }
 0x203   : > { %v592_v56 = vmax.f32 %v588_v53, 0.0 }
 0x204   : > { %v593_v57 = vmax.f32 %v590_v55, 0.0 }
 0x205   : > { %677 = vst [vmem:[#allocation3 + $0x40] sm:$0xf] %v592_v56  ;;  %594 = vst [vmem:[#allocation2 + $0x8] sm:$0xf] %v592_v56 }
 0x206   : > { %678 = vst [vmem:[#allocation3 + $0x48] sm:$0xf] %v593_v57  ;;  %595 = vst [vmem:[#allocation2 + $0x10] sm:$0xf] %v593_v57 }
 0x20c   : > { %v618_v58 = vld [vmem:[#allocation2 + $0x8] sm:$0xf] }
 0x20d   : > { %v636_v61 = vld [vmem:[#allocation2 + $0x8] sm:$0xf]  ;;  %625 = vrot.lane.b32.xlu0 %v618_v58, %s1012_s9  ;;  %v619_v62 = vld [vmem:[#allocation2 + $0x10] sm:$0xf] }
 0x20e   : > { %627 = vrot.lane.b32.xlu1 %v619_v62, %s1012_s9  ;;  %v639_v0 = vmul.f32 %v636_v61, %v1147_v52  ;;  %v657_v1 = vld [vmem:[#allocation2 + $0x8] sm:$0xf]  ;;  %v722_v2 = vld [vmem:[#allocation2 + $0x10] sm:$0xf] }
 0x20f   : > { %v597_v3 = vld [vmem:[#allocation2 + $0x8] sm:$0xf]  ;;  %v660_v4 = vmul.f32 %v657_v1, %v1157_v59  ;;  %v598_v8 = vld [vmem:[#allocation2 + $0x10] sm:$0xf] }
 0x210   : > { %v600_v6 = vmul.f32 %v597_v3, %v1134_v44  ;;  %v679_v7 = vld [vmem:[#allocation2 + $0x8] sm:$0xf]  ;;  %v601_v52 = vmul.f32 %v598_v8, %v1105_v25  ;;  %v680_v10 = vld [vmem:[#allocation2 + $0x10] sm:$0xf] }
 0x211   : > { %646 = vrot.lane.b32.xlu0 %v639_v0, %s1010_s7  ;;  %v682_v9 = vmul.f32 %v679_v7, %v1119_v35  ;;  %v637_v13 = vld [vmem:[#allocation2 + $0x10] sm:$0xf]  ;;  %v683_v59 = vmul.f32 %v680_v10, %v1177_v5  ;;  %v700_v25 = vld [vmem:[#allocation2 + $0x8] sm:$0xf]  ;;  %v744_v5 = vmul.f32 %v741_v16, %v1138_v48  ;;  %v606_v48 = vpop.permute.xlu0 %605 }
 0x212   : > { %729 = vrot.lane.b32.xlu1 %v722_v2, %s1013_s10  ;;  %v640_v44 = vmul.f32 %v637_v13, %v1103_v24  ;;  %v658_v14 = vld [vmem:[#allocation2 + $0x10] sm:$0xf]  ;;  %v721_v17 = vld [vmem:[#allocation2 + $0x8] sm:$0xf]  ;;  %v703_v18 = vmul.f32 %v700_v25, %v1127_v41 }
 0x213   : > { %v661_v35 = vmul.f32 %v658_v14, %v1111_v29  ;;  %v701_v24 = vld [vmem:[#allocation2 + $0x10] sm:$0xf]  ;;  %v739_v23 = vld [vmem:[#allocation2 + $0x8] sm:$0xf] }
 0x214   : > { %v704_v21 = vmul.f32 %v701_v24, %v1162_v60  ;;  %v740_v29 = vld [vmem:[#allocation2 + $0x10] sm:$0xf]  ;;  %v742_v26 = vmul.f32 %v739_v23, %v1140_v49  ;;  %v624_v60 = vpop.permute.xlu1 %623  ;;  %v769_v24 = vld [vmem:[#allocation3 + $0x40] sm:$0xff] }
 0x215   : > { %667 = vrot.lane.b32.xlu0 %v660_v4, %s1009_s6  ;;  %v743_v41 = vmul.f32 %v740_v29, %v1169_v63  ;;  %v645_v27 = vpop.permute.xlu0 %644 }
 0x216   : > { %607 = vrot.lane.b32.xlu1 %v600_v6, %s1011_s8 }
 0x218   : > { %v666_v28 = vpop.permute.xlu1 %665 }
 0x219   : > { %688 = vrot.lane.b32.xlu0 %v682_v9, %s1008_s30  ;;  %v714_v30 = vpop.permute.xlu0 %713 }
 0x21a   : > { %609 = vrot.lane.b32.xlu1 %v601_v52, %s1011_s8 }
 0x21c   : > { %v693_v31 = vpop.permute.xlu1 %692 }
 0x21d   : > { %690 = vrot.lane.b32.xlu0 %v683_v59, %s1008_s30 }
 0x21e   : > { %648 = vrot.lane.b32.xlu1 %v640_v44, %s1010_s7 }
 0x221   : > { %731 = vrot.lane.b32.xlu0 %v723_v15, %s1013_s10  ;;  %v770_v15 = vld [vmem:[#allocation3 + $0x48] sm:$0xff] }
 0x222   : > { %669 = vrot.lane.b32.xlu1 %v661_v35, %s1009_s6 }
 0x225   : > { %727 = vrot.lane.b32.xlu0 %v721_v17, %s1013_s10 }
 0x226   : > { %709 = vrot.lane.b32.xlu1 %v703_v18, %s1006_s25 }
 0x229   : > { %752 = vrot.lane.b32.xlu0 %v744_v5, %s1007_s26 }
 0x22a   : > { %711 = vrot.lane.b32.xlu1 %v704_v21, %s1006_s25 }
 0x22d   : > { %783 = vperm.xlu0 %995, %v939_v22  }
 0x22e   : > { %750 = vrot.lane.b32.xlu1 %v743_v41, %s1007_s26 }
 0x232   : > { %748 = vrot.lane.b32.xlu1 %v742_v26, %s1007_s26 }
 0x27f   : > { %v626_v32 = vpop.permute.xlu0 %625 }
 0x280   : > { %v629_v33 = vsel %vm306_vm2, %v624_v60, %v626_v32  ;;  %v628_v34 = vpop.permute.xlu1 %627 }
 0x281   : > { %633 = vst [vmem:[#allocation3 + $0x10] sm:$0xf] %v629_v33  ;;  %v630_v63 = vsel %vm306_vm2, %v626_v32, %v628_v34 }
 0x282   : > { %634 = vst [vmem:[#allocation3 + $0x18] sm:$0xf] %v630_v63 }
 0x283   : > { %v647_v37 = vpop.permute.xlu0 %646 }
 0x284   : > { %v650_v38 = vsel %vm346_vm4, %v645_v27, %v647_v37  ;;  %v730_v49 = vpop.permute.xlu1 %729 }
 0x285   : > { %654 = vst [vmem:[#allocation3 + $0x20] sm:$0xf] %v650_v38 }
 0x287   : > { %v668_v39 = vpop.permute.xlu0 %667 }
 0x288   : > { %v671_v42 = vsel %vm377_vm6, %v666_v28, %v668_v39  ;;  %v608_v20 = vpop.permute.xlu1 %607  ;;  %v763_v0 = vld [vmem:[#allocation3 + $0x10] sm:$0xff]  ;;  %v760_v28 = vld [vmem:[%s1293_s2] sm:$0xf] }
 0x289   : > { %675 = vst [vmem:[#allocation3 + $0x30] sm:$0xf] %v671_v42  ;;  %v611_v43 = vsel %vm287_vm5, %v606_v48, %v608_v20  ;;  %v764_v61 = vld [vmem:[#allocation3 + $0x18] sm:$0xff] }
 0x28a   : > { %615 = vst [vmem:[#allocation3] sm:$0xf] %v611_v43 }
 0x28b   : > { %v689_v45 = vpop.permute.xlu0 %688 }
 0x28c   : > { %v610_v46 = vpop.permute.xlu1 %609  ;;  %v765_v44 = vld [vmem:[#allocation3 + $0x20] sm:$0xff] }
 0x28d   : > { %v612_v47 = vsel %vm287_vm5, %v608_v20, %v610_v46 }
 0x28e   : > { %616 = vst [vmem:[#allocation3 + $0x8] sm:$0xf] %v612_v47 }
 0x28f   : > { %v691_v36 = vpop.permute.xlu0 %690 }
 0x290   : > { %v694_v19 = vsel %vm360_vm3, %v689_v45, %v691_v36  ;;  %v695_v50 = vsel %vm360_vm3, %v691_v36, %v693_v31  ;;  %v649_v40 = vpop.permute.xlu1 %648  ;;  %v767_v7 = vld [vmem:[#allocation3 + $0x30] sm:$0xff] }
 0x291   : > { %698 = vst [vmem:[#allocation3 + $0x50] sm:$0xf] %v694_v19  ;;  %699 = vst [vmem:[#allocation3 + $0x58] sm:$0xf] %v695_v50  ;;  %v651_v51 = vsel %vm346_vm4, %v647_v37, %v649_v40  ;;  %v761_v56 = vld [vmem:[#allocation3] sm:$0xff]  ;;  %v967_v14 = vpack.c.bf16 %v767_v7, %v765_v44 }
 0x292   : > { %655 = vst [vmem:[#allocation3 + $0x28] sm:$0xf] %v651_v51  ;;  %v963_v2 = vpack.c.bf16 %v763_v0, %v761_v56 }
 0x293   : > { %v732_v53 = vpop.permute.xlu0 %731 }
 0x294   : > { %v734_v54 = vsel %vm456_vm7, %v730_v49, %v732_v53  ;;  %v670_v55 = vpop.permute.xlu1 %669 }
 0x295   : > { %738 = vst [vmem:[#allocation3 + $0x78] sm:$0xf] %v734_v54  ;;  %v672_v57 = vsel %vm377_vm6, %v668_v39, %v670_v55  ;;  %v762_v58 = vld [vmem:[#allocation3 + $0x8] sm:$0xff] }
 0x296   : > { %676 = vst [vmem:[#allocation3 + $0x38] sm:$0xf] %v672_v57  ;;  %v961_v62 = vpack.c.bf16 %v764_v61, %v762_v58 }
 0x297   : > { %v728_v1 = vpop.permute.xlu0 %727 }
 0x298   : > { %v733_v3 = vsel %vm456_vm7, %v728_v1, %v730_v49  ;;  %962 = vmatprep.subr.bf16.mxu1 %v961_v62  ;;  %v710_v4 = vpop.permute.xlu1 %709  ;;  %v772_v13 = vld [vmem:[#allocation3 + $0x58] sm:$0xff]  ;;  %v771_v17 = vld [vmem:[#allocation3 + $0x50] sm:$0xff] }
 0x299   : > { %737 = vst [vmem:[#allocation3 + $0x70] sm:$0xf] %v733_v3  ;;  %964 = vmatpush1.bf16.msra.mxu1 %v963_v2  ;;  %v766_v52 = vld [vmem:[#allocation3 + $0x28] sm:$0xff]  ;;  %v969_v16 = vpack.c.bf16 %v772_v13, %v770_v15  ;;  %v971_v5 = vpack.c.bf16 %v771_v17, %v769_v24 }
 0x29b   : > { %v753_v35 = vpop.permute.xlu0 %752 }
 0x29c   : > { %v712_v6 = vpop.permute.xlu1 %711  ;;  %v776_v29 = vld [vmem:[#allocation3 + $0x78] sm:$0xff] }
 0x29d   : > { %v715_v8 = vsel %vm329_vm1, %v710_v4, %v712_v6  ;;  %v716_v9 = vsel %vm329_vm1, %v712_v6, %v714_v30  ;;  %v768_v10 = vld [vmem:[#allocation3 + $0x38] sm:$0xff] }
 0x29e   : > { %719 = vst [vmem:[#allocation3 + $0x60] sm:$0xf] %v715_v8  ;;  %720 = vst [vmem:[#allocation3 + $0x68] sm:$0xf] %v716_v9  ;;  %v965_v59 = vpack.c.bf16 %v768_v10, %v766_v52 }
 0x2a0   : > { %966 = vmatprep.subr.bf16.mxu1 %v965_v59  ;;  %v751_v25 = vpop.permute.xlu1 %750  ;;  %v775_v26 = vld [vmem:[#allocation3 + $0x70] sm:$0xff] }
 0x2a1   : > { %v755_v18 = vsel %vm270_vm0, %v751_v25, %v753_v35  ;;  %968 = vmatpush1.bf16.msra.mxu1 %v967_v14 }
 0x2a2   : > { %759 = vst [vmem:[#allocation3 + $0x88] sm:$0xf] %v755_v18  ;;  %970 = vmatprep.subr.bf16.mxu1 %v969_v16 }
 0x2a4   : > { %v749_v21 = vpop.permute.xlu1 %748 }
 0x2a5   : > { %v754_v22 = vsel %vm270_vm0, %v749_v21, %v751_v25  ;;  %972 = vmatpush1.bf16.msra.mxu1 %v971_v5  ;;  %v774_v41 = vld [vmem:[#allocation3 + $0x68] sm:$0xff]  ;;  %v773_v23 = vld [vmem:[#allocation3 + $0x60] sm:$0xff] }
 0x2a6   : > { %758 = vst [vmem:[#allocation3 + $0x80] sm:$0xf] %v754_v22  ;;  %v973_v48 = vpack.c.bf16 %v776_v29, %v774_v41  ;;  %v975_v60 = vpack.c.bf16 %v775_v26, %v773_v23 }
 0x2a8   : > { %974 = vmatprep.subr.bf16.mxu1 %v973_v48 }
 0x2a9   : > { %976 = vmatpush1.bf16.msra.mxu1 %v975_v60  ;;  %v778_v27 = vld [vmem:[#allocation3 + $0x88] sm:$0xff] }
 0x2aa   : > { %805 = vmatprep.subr.mxu1 %v778_v27 }
 0x2ac   : > { %v784_v31 = vpop.permute.xlu0 %783 }
 0x2ad   : > { %v777_v30 = vld [vmem:[#allocation3 + $0x80] sm:$0xff] }
 0x2ae   : > { %806 = vmatpush1.msra.mxu1 %v777_v30 }
 0x2af   : > { %940 = vmatmul.mubr.msk.f32.vlgmr.msra.gmra.mrb[0].mxu1 %vm517_vm8, %v760_v28 }
 0x382   : > { %v855_v32 = vpop.f32.mrb[0].mxu1 }
 0x383   : > { %v856_v33 = vadd.f32 %v855_v32, %v784_v31  ;;  %v857_v34 = vpop.f32.mrb[1].mxu1 }
 0x384   : > { %v858_v63 = vadd.f32 %v857_v34, %v784_v31 }
 0x385   : > { %v864_v37 = vadd.f32 %v856_v33, %v1073_v11 }
 0x386   : > { %v865_v38 = vadd.f32 %v858_v63, %v1077_v12 }
 0x387   : > { %v866_v49 = vmax.f32 %v864_v37, 0.0 }
 0x388   : > { %v867_v39 = vmax.f32 %v865_v38, 0.0 }
 0x38a   : > { %v870_v42 = vcombine.low %v866_v49, %v867_v39 }
 0x38c   : > { %872 = vst [vmem:[%s224_s23] sm:$0xff] %v870_v42 }
 0x38d PF: > { %s15_s18 = sadd.s32 1, %s1003_s18  }
 0x38e   : > { %p12_p4 = scmp.ge.s32.totalorder %s15_s18, 4  }
 0x390   :  { %14 = sbr.rel (!%p12_p4) target bundleno = 1 (0x1), region = 72 }

</bundles_post_ra>
